<compile_context>
chip_gen: v7x
topology: tpu7x:2x2x1
jax: 0.10.0
libtpu: 0.0.40
codegen_flags: <defaults>
</compile_context>

<pallas_src>
import jax
import jax.numpy as jnp
from jax.experimental import pallas as pl
from jax.experimental.pallas import tpu as pltpu


def _u8_to_unit_kernel(x_ref, o_ref):
    # x_ref: (r_blk, l_blk) uint8 block; o_ref: (r_blk, l_blk) float block.
    # Note: /255.0 is ~1 ulp from torch's exact division (f32 divide vs recip+mul);
    # well within atol=1e-6. Memory-bound, so the divide is free.
    x = x_ref[...].astype(jnp.float32)
    o_ref[...] = (x / jnp.float32(255.0)).astype(o_ref.dtype)


def _choose_block(rows, hw, out_itemsize, budget_bytes):
    """Pick (row_block, lane_block) so in+out (double-buffered) stays under budget."""
    per_elem = (1 + out_itemsize) * 2  # uint8 in + out dtype, x2 double buffering
    if rows * hw * per_elem <= budget_bytes:
        return rows, hw  # whole problem in one coarse block
    # Chunk rows (sublane axis) first, keep the full lane-dense H*W width.
    max_rows = budget_bytes // (hw * per_elem)
    if max_rows >= 8:
        return int((max_rows // 8) * 8), hw
    # A single 8-row slab is still too big -> also chunk lanes (multiple of 128).
    r_blk = min(rows, 8)
    max_lanes = budget_bytes // (r_blk * per_elem)
    l_blk = max(128, int((max_lanes // 128) * 128))
    return r_blk, min(hw, l_blk)


def _preprocess_video_pallas(video_thwc, out_dtype, block_budget_bytes):
    T, H, W, C = video_thwc.shape
    rows, hw = C * T, H * W

    # Layout glue: (T,H,W,C) -> (C,T,H,W) element order, flattened to lane-dense 2D.
    x2d = jnp.transpose(video_thwc, (3, 0, 1, 2)).reshape(rows, hw)

    r_blk, l_blk = _choose_block(rows, hw, jnp.dtype(out_dtype).itemsize,
                                 block_budget_bytes)
    grid = (pl.cdiv(rows, r_blk), pl.cdiv(hw, l_blk))

    out2d = pl.pallas_call(
        _u8_to_unit_kernel,
        out_shape=jax.ShapeDtypeStruct((rows, hw), out_dtype),
        grid=grid,
        in_specs=[pl.BlockSpec((r_blk, l_blk), lambda i, j: (i, j))],
        out_specs=pl.BlockSpec((r_blk, l_blk), lambda i, j: (i, j)),
        compiler_params=pltpu.CompilerParams(
            dimension_semantics=("parallel", "parallel"),
        ),
    )(x2d)

    # Permute([1,0,2,3]) is already baked into the row order -> free reshape.
    return out2d.reshape(C, T, H, W)


def _preprocess_video_xla(video_thwc, out_dtype):
    v = video_thwc.astype(jnp.float32) / jnp.float32(255.0)
    return jnp.transpose(v, (3, 0, 1, 2)).astype(out_dtype)


def preprocess_video(video_thwc,
                     *,
                     out_dtype=jnp.float32,
                     force_pallas=False,
                     min_pallas_bytes=1 << 20,
                     block_budget_bytes=8 << 20):
    """(T, H, W, C) uint8 -> (C, T, H, W) float in [0, 1]."""
    assert video_thwc.dtype == jnp.uint8 and video_thwc.ndim == 4
    if not force_pallas and video_thwc.size < min_pallas_bytes:
        # Tiny clip: a fused XLA convert+scale+transpose beats any pallas_call launch.
        return _preprocess_video_xla(video_thwc, out_dtype)
    return _preprocess_video_pallas(video_thwc, out_dtype, block_budget_bytes)


def pre_process(x: dict, **kwargs) -> dict:
    """ApplyTransformToKey(key='video', ...): transform only the 'video' entry."""
    x_out = dict(x)
    x_out["video"] = preprocess_video(x["video"], **kwargs)
    return x_out


if __name__ == "__main__":
    key = jax.random.PRNGKey(0)
    T, H, W, C = 8, 16, 16, 3  # small clip: 8 frames of 16x16 RGB

    frames = jax.random.randint(key, (T, H, W, C), 0, 256, dtype=jnp.int32).astype(
        jnp.uint8
    )
    x = {"video": frames, "label": jnp.int32(1)}

    # Reference: (T,H,W,C) uint8 -> float32/255 -> permute to (C,T,H,W)
    ref = jnp.transpose(frames.astype(jnp.float32) / 255.0, (3, 0, 1, 2))

    # 1) Pallas path, single coarse block (default VMEM budget).
    y = pre_process(x, force_pallas=True)
    vid = jax.block_until_ready(y["video"])
    assert vid.shape == (C, T, H, W)
    assert vid.dtype == jnp.float32
    assert jnp.allclose(vid, ref, atol=1e-6)
    assert y["label"] == x["label"]

    # 2) Pallas path, forced row+lane chunking (blocks (8,128), grid (3,2)).
    vid2 = jax.block_until_ready(
        preprocess_video(frames, force_pallas=True, block_budget_bytes=16 * 1024)
    )
    assert jnp.allclose(vid2, ref, atol=1e-6)

    # 3) Pallas path, ragged row count (masked remainder block).
    frames5 = jax.random.randint(
        jax.random.PRNGKey(0), (5, H, W, C), 0, 256, dtype=jnp.int32
    ).astype(jnp.uint8)
    ref5 = jnp.transpose(frames5.astype(jnp.float32) / 255.0, (3, 0, 1, 2))
    vid3 = jax.block_until_ready(
        preprocess_video(frames5, force_pallas=True, block_budget_bytes=16 * 1024)
    )
    assert vid3.shape == (C, 5, H, W)
    assert jnp.allclose(vid3, ref5, atol=1e-6)

    # 4) Auto path: tiny input routes to the fused XLA fallback, same numerics.
    vid4 = jax.block_until_ready(preprocess_video(frames))
    assert jnp.allclose(vid4, ref, atol=1e-6)

    print("KERNEL_OK")
</pallas_src>

<mosaic_0001>
module attributes {stable_mosaic.version = 11 : i64} {
  func.func @_u8_to_unit_kernel(%arg0: i32, %arg1: i32, %arg2: memref<24x256xi8, #tpu.memory_space<vmem>>, %arg3: memref<24x256xf32, #tpu.memory_space<vmem>>) attributes {dimension_semantics = [#tpu.dimension_semantics<parallel>, #tpu.dimension_semantics<parallel>], iteration_bounds = array<i64: 1, 1>, scalar_prefetch = 0 : i64, scratch_operands = 0 : i64, tpu.core_type = #tpu.core_type<tc>, window_params = [{transform_indices = @transform_0, window_bounds = array<i64: 24, 256>}, {transform_indices = @transform_1, window_bounds = array<i64: 24, 256>}]} {
    %c0 = arith.constant 0 : index
    %c0_0 = arith.constant 0 : index
    %0 = vector.load %arg2[%c0, %c0_0] : memref<24x256xi8, #tpu.memory_space<vmem>>, vector<24x256xi8>
    %1 = arith.uitofp %0 : vector<24x256xi8> to vector<24x256xf32>
    %cst = arith.constant 2.550000e+02 : f32
    %2 = vector.broadcast %cst : f32 to vector<24x256xf32>
    %3 = arith.divf %1, %2 : vector<24x256xf32>
    %c0_1 = arith.constant 0 : index
    %c0_2 = arith.constant 0 : index
    %4 = vector.load %arg3[%c0_1, %c0_2] : memref<24x256xf32, #tpu.memory_space<vmem>>, vector<24x256xf32>
    tpu.vector_store %arg3[%c0_1, %c0_2], %3 {strides = array<i32>} : memref<24x256xf32, #tpu.memory_space<vmem>>, vector<24x256xf32>,
    return
  }
  func.func @transform_0(%arg0: i32, %arg1: i32) -> (i32, i32) {
    %c0_i32 = arith.constant 0 : i32
    return %arg0, %arg1 : i32, i32
  }
  func.func @transform_1(%arg0: i32, %arg1: i32) -> (i32, i32) {
    %c0_i32 = arith.constant 0 : i32
    return %arg0, %arg1 : i32, i32
  }
}

</mosaic_0001>

<bundles_post_ra>
// kernel: tpu_custom_call.1
= control target key start
LH: loop header
LB: loop body
LE: loop exit
PB: predicated region body
PF: predicated region fallthrough
CT: control target
= control target key end

     0   :  { %6 = vsyncpa [#allocation3], 0  ;;  %s174_s0 = inlined_call_operand.hbm [shape: u8[24,256], index: 0, kind: input, shape index: {}]   ;;  %s175_s1 = inlined_call_operand.hbm [shape: f32[24,256], index: 1, kind: output, shape index: {}]  }
   0x1   :  { %7 = vsyncpa [#allocation4], 0  ;;  %s134_s6 = smov [#allocation2]   ;;  %s86_s10 = scalar_lea.hbm %s174_s0, 192 }
   0x2   :  { %s13_s7 = sshll.u32 %s134_s6, 4  ;;  %p87_p0 = scmp.ne.s32.totalorder %s174_s0, %s86_s10  ;;  %s14_s7 = int_to_ptr.vmem [resolvable:$true] %s13_s7 }
   0x3   :  { %p90_p1 = scmp.lt.u32.totalorder %s86_s10, %s174_s0 }
   0x5   :  { %p92_p2 = pnand %p90_p1, %p87_p0 }
   0x7   :  { %95 = shalt.err (!%p92_p2)
}
   0x8   :  { %s96_s15 = scalar_lea.vmem %s14_s7, 192  ;;  %p101_p4 = scmp.lt.s32.totalorder %s14_s7, %s14_s7 }
   0x9   :  { %p97_p3 = scmp.ne.s32.totalorder %s14_s7, %s96_s15  ;;  %p102_p5 = scmp.lt.s32.totalorder %s96_s15, %s96_s15 }
   0xb   :  { %p103_p6 = por %p102_p5, %p101_p4 }
   0xd   :  { %p104_p7 = pnand %p103_p6, %p97_p3 }
   0xf   :  { %107 = shalt.err (!%p104_p7)
}
  0x10   :  { %s135_s16 = smov 64   ;;  %s136_s17 = smov 4  }
  0x11   :  { %19 = dma.hbm_to_vmem [thread:$0]  %s174_s0, 192, %s14_s7, [#allocation3], %s135_s16, %s135_s16, %s136_s17  }
  0x12   :  { %130 = dma.done.wait [#allocation3], 192  }
  0x13   :  { %131 = vsyncadd [#allocation3], 4294967104  ;;  %v75_v0 = vld [vmem:[#allocation2] sm:$0xff]   ;;  %v25_v1 = vld [vmem:[#allocation2 + $0x8] sm:$0xf]  ;;  %s137_s0 = smov [#allocation5]  }
  0x14   :  { %v76_v2 = vunpack.c.0.s8 %v75_v0  ;;  %v77_v3 = vunpack.c.1.s8 %v75_v0  ;;  %v78_v4 = vunpack.c.2.s8 %v75_v0  ;;  %v79_v5 = vunpack.c.3.s8 %v75_v0  ;;  %s62_s20 = sshll.u32 %s137_s0, 4  ;;  %s63_s20 = int_to_ptr.vmem [resolvable:$true] %s62_s20 }
  0x15   :  { %v30_v6 = vunpack.c.0.s8 %v25_v1  ;;  %v31_v7 = vunpack.c.1.s8 %v25_v1  ;;  %s108_s21 = scalar_lea.vmem %s63_s20, 768  ;;  %p113_p9 = scmp.lt.s32.totalorder %s63_s20, %s63_s20 }
  0x16   :  { %v32_v8 = vand.u32 255, %v76_v2  ;;  %v33_v9 = vand.u32 255, %v77_v3  ;;  %v34_v10 = vand.u32 255, %v78_v4  ;;  %v35_v11 = vand.u32 255, %v79_v5  ;;  %p109_p8 = scmp.ne.s32.totalorder %s63_s20, %s108_s21  ;;  %p114_p10 = scmp.lt.s32.totalorder %s108_s21, %s108_s21 }
  0x17   :  { %v36_v12 = vand.u32 255, %v30_v6  ;;  %v37_v13 = vand.u32 255, %v31_v7 }
  0x18   :  { %v38_v14 = vcvt.s32.f32 %v32_v8  ;;  %v39_v15 = vcvt.s32.f32 %v33_v9  ;;  %v40_v16 = vcvt.s32.f32 %v34_v10  ;;  %v41_v17 = vcvt.s32.f32 %v35_v11  ;;  %p115_p11 = por %p114_p10, %p113_p9 }
  0x19   :  { %v42_v18 = vcvt.s32.f32 %v36_v12  ;;  %v43_v19 = vcvt.s32.f32 %v37_v13 }
  0x1a   :  { %v45_v20 = vmul.f32 0.003921569, %v38_v14  ;;  %v46_v21 = vmul.f32 0.003921569, %v39_v15  ;;  %v47_v22 = vmul.f32 0.003921569, %v40_v16  ;;  %p116_p12 = pnand %p115_p11, %p109_p8 }
  0x1b   :  { %v48_v23 = vmul.f32 0.003921569, %v41_v17  ;;  %v49_v24 = vmul.f32 0.003921569, %v42_v18  ;;  %v50_v25 = vmul.f32 0.003921569, %v43_v19 }
  0x1c   :  { %51 = vst [vmem:[#allocation5] sm:$0xff] %v45_v20  ;;  %52 = vst [vmem:[#allocation5 + $0x8] sm:$0xff] %v46_v21 }
  0x1d   :  { %53 = vst [vmem:[#allocation5 + $0x10] sm:$0xff] %v47_v22  ;;  %54 = vst [vmem:[#allocation5 + $0x18] sm:$0xff] %v48_v23 }
  0x1e   :  { %55 = vst [vmem:[#allocation5 + $0x20] sm:$0xff] %v49_v24  ;;  %56 = vst [vmem:[#allocation5 + $0x28] sm:$0xff] %v50_v25 }
  0x1f   :  { %119 = shalt.err (!%p116_p12)
}
  0x20   :  { %s120_s24 = scalar_lea.hbm %s175_s1, 768 }
  0x21   :  { %p121_p13 = scmp.ne.s32.totalorder %s175_s1, %s120_s24  ;;  %p124_p0 = scmp.lt.u32.totalorder %s120_s24, %s175_s1 }
  0x23   :  { %p126_p1 = pnand %p124_p0, %p121_p13 }
  0x25   :  { %129 = shalt.err (!%p126_p1)
}
  0x26   :  { %s138_s29 = smov 256   ;;  %s139_s30 = smov 16  }
  0x27   :  { %68 = dma.vmem_to_hbm [thread:$0]  %s63_s20, 768, %s175_s1, [#allocation4], %s138_s29, %s138_s29, %s139_s30  }
  0x28   :  { %132 = dma.done.wait [#allocation4], 768  }
  0x29   :  { %133 = vsyncadd [#allocation4], 4294966528 }
  0x2a   :  { %72 = vsyncpa [#allocation3], 1 }
  0x2b   :  { %73 = vsyncpa [#allocation4], 1 }

</bundles_post_ra>
